<compile_context>
chip_gen: v5e
topology: v5e:2x2
jax: 0.10.0
libtpu: 0.0.40
codegen_flags: <defaults>
</compile_context>

<pallas_src>
import jax
import jax.numpy as jnp
from jax import lax
from jax.experimental import pallas as pl
from jax.experimental.pallas import tpu as pltpu


def _round_up(x: int, m: int) -> int:
    return ((x + m - 1) // m) * m


def _decoder_kernel(hr_ref, w_ref, hd_ref, out_ref, supp1_ref):
    """Computes one (tm, tn) tile of decoder = (HR @ W) @ HD^T.

    grid = (M_tiles, N_tiles); N is the innermost ("arbitrary") axis so the
    supp1 scratch written at j == 0 persists and is reused for every N tile
    belonging to the same M row-block.
    """

    @pl.when(pl.program_id(1) == 0)
    def _():
        # supp1 = HR_tile @ W  (MXU, f32 accumulate) -- once per M row-block.
        supp1_ref[...] = jnp.dot(
            hr_ref[...], w_ref[...], preferred_element_type=jnp.float32
        )

    # decoder_tile = supp1 @ HD_tile^T, expressed as a contraction over the
    # last dim of BOTH operands so the MXU consumes HD in its native
    # row-major layout (no transpose materialized).
    out_ref[...] = lax.dot_general(
        supp1_ref[...].astype(hd_ref.dtype),
        hd_ref[...],
        dimension_numbers=(((1,), (1,)), ((), ())),
        preferred_element_type=jnp.float32,
    ).astype(out_ref.dtype)


def decoder_forward(H, train_W, drug_num, target_num, *, use_pallas=None,
                    tm_pref=256, tn_pref=256):
    """Pallas equivalent of Decoder.forward(H, drug_num, target_num)."""
    hidden = H.shape[1]
    HR = H[:drug_num]                               # (drug_num, hidden)
    HD = H[drug_num:drug_num + target_num]          # (target_num, hidden)

    if use_pallas is None:
        # For tiny problems the pallas_call / grid / DMA overhead dominates;
        # let XLA's fused matmul handle it.
        use_pallas = (drug_num * target_num) >= (128 * 128)
    if not use_pallas:
        return jnp.dot(jnp.dot(HR, train_W), HD.T)

    dtype = H.dtype
    itemsize = jnp.dtype(dtype).itemsize

    # ---- padded, tile-aligned geometry ------------------------------------
    # hidden resident in full per tile; a K ("hidden") grid axis with a f32
    # accumulator would only be needed for very large hidden (>~4-8K on v7x).
    hid_p = _round_up(hidden, 128)

    m8 = _round_up(drug_num, 8)
    if m8 <= tm_pref:
        tm, m_pad = m8, m8
    else:
        tm = tm_pref
        m_pad = _round_up(drug_num, tm)

    n128 = _round_up(target_num, 128)
    if n128 <= tn_pref:
        tn = n128
    elif n128 % tn_pref == 0:
        tn = tn_pref
    else:
        tn = 128
    n_pad = _round_up(target_num, tn)

    # Zero padding keeps the math exact; padded rows/cols are sliced off below.
    HR_p = jnp.pad(HR, ((0, m_pad - drug_num), (0, hid_p - hidden)))
    HD_p = jnp.pad(HD, ((0, n_pad - target_num), (0, hid_p - hidden)))
    W_p = jnp.pad(train_W.astype(dtype),
                  ((0, hid_p - hidden), (0, hid_p - hidden)))

    grid = (m_pad // tm, n_pad // tn)

    # VMEM budget: double-buffered input/output tiles + the f32 supp1 scratch.
    per_step = (tm * hid_p + hid_p * hid_p + tn * hid_p + tm * tn) * itemsize
    vmem_needed = 2 * per_step + tm * hid_p * 4
    vmem_limit = min(max(int(1.5 * vmem_needed), 32 << 20), 96 << 20)

    flops = 2 * m_pad * hid_p * hid_p + 2 * m_pad * n_pad * hid_p
    bytes_accessed = (HR_p.size + grid[0] * (W_p.size + HD_p.size)
                      + m_pad * n_pad) * itemsize

    out_padded = pl.pallas_call(
        _decoder_kernel,
        out_shape=jax.ShapeDtypeStruct((m_pad, n_pad), dtype),
        grid_spec=pltpu.PrefetchScalarGridSpec(
            num_scalar_prefetch=0,
            grid=grid,
            in_specs=[
                pl.BlockSpec((tm, hid_p), lambda i, j: (i, 0)),      # HR tile
                pl.BlockSpec((hid_p, hid_p), lambda i, j: (0, 0)),   # W
                pl.BlockSpec((tn, hid_p), lambda i, j: (j, 0)),      # HD tile
            ],
            out_specs=pl.BlockSpec((tm, tn), lambda i, j: (i, j)),
            scratch_shapes=[pltpu.VMEM((tm, hid_p), jnp.float32)],   # supp1
        ),
        compiler_params=pltpu.CompilerParams(
            # M axis shards across TensorCores; N must stay sequential
            # ("arbitrary") for the supp1-reuse pattern to be valid.
            dimension_semantics=("parallel", "arbitrary"),
            vmem_limit_bytes=vmem_limit,
        ),
        cost_estimate=pl.CostEstimate(
            flops=flops, transcendentals=0, bytes_accessed=bytes_accessed),
    )(HR_p, W_p, HD_p)

    return out_padded[:drug_num, :target_num]


if __name__ == "__main__":
    # Small but non-trivially-shaped synthetic problem: exercises padding
    # (hidden 96 -> 128, target 300 -> 384), tiling (grid (1, 3)) and the
    # supp1-reuse path.
    drug_num, target_num, hidden = 200, 300, 96
    key = jax.random.PRNGKey(0)
    k_h, k_w = jax.random.split(key)

    H = jax.random.normal(k_h, (drug_num + target_num, hidden),
                          dtype=jnp.float32)
    train_W = jax.random.normal(k_w, (hidden, hidden), dtype=jnp.float32) * 0.1

    out = decoder_forward(H, train_W, drug_num, target_num, use_pallas=True)
    out = jax.block_until_ready(out)

    # Reference (same math as the torch module), highest-precision f32 matmul.
    HR = H[:drug_num]
    HD = H[drug_num:drug_num + target_num]
    ref = jnp.dot(jnp.dot(HR, train_W, precision="highest"), HD.T,
                  precision="highest")

    assert out.shape == (drug_num, target_num), out.shape
    # Tolerance allows for MXU default-precision f32 accumulation differences;
    # real indexing/padding bugs would produce O(1)-O(10) errors.
    max_err = float(jnp.max(jnp.abs(out - ref)))
    assert jnp.allclose(out, ref, atol=2e-2, rtol=2e-2), max_err

    print("KERNEL_OK")
</pallas_src>

<mosaic_0001>
module attributes {stable_mosaic.version = 11 : i64} {
  func.func @_decoder_kernel(%arg0: i32, %arg1: i32, %arg2: memref<200x128xf32, #tpu.memory_space<vmem>>, %arg3: memref<128x128xf32, #tpu.memory_space<vmem>>, %arg4: memref<128x128xf32, #tpu.memory_space<vmem>>, %arg5: memref<200x128xf32, #tpu.memory_space<vmem>>, %arg6: memref<200x128xf32, #tpu.memory_space<vmem>>) attributes {dimension_semantics = [#tpu.dimension_semantics<parallel>, #tpu.dimension_semantics<arbitrary>], iteration_bounds = array<i64: 1, 3>, scalar_prefetch = 0 : i64, scratch_operands = 1 : i64, tpu.core_type = #tpu.core_type<tc>, window_params = [{transform_indices = @transform_0, window_bounds = array<i64: 200, 128>}, {pipeline_mode = #tpu.pipeline_mode<synchronous>, transform_indices = @transform_1, window_bounds = array<i64: 128, 128>}, {transform_indices = @transform_2, window_bounds = array<i64: 128, 128>}, {transform_indices = @transform_3, window_bounds = array<i64: 200, 128>}]} {
    %c0_i32 = arith.constant 0 : i32
    %0 = arith.cmpi eq, %arg1, %c0_i32 : i32
    %1 = arith.extui %0 : i1 to i32
    %c0_i32_0 = arith.constant 0 : i32
    %2 = arith.cmpi ne, %1, %c0_i32_0 : i32
    scf.if %2 {
      %c0_6 = arith.constant 0 : index
      %c0_7 = arith.constant 0 : index
      %7 = vector.load %arg2[%c0_6, %c0_7] : memref<200x128xf32, #tpu.memory_space<vmem>>, vector<200x128xf32>
      %c0_8 = arith.constant 0 : index
      %c0_9 = arith.constant 0 : index
      %8 = vector.load %arg3[%c0_8, %c0_9] : memref<128x128xf32, #tpu.memory_space<vmem>>, vector<128x128xf32>
      %cst_10 = arith.constant dense<0.000000e+00> : vector<200x128xf32>
      %9 = tpu.matmul %7, %8, %cst_10 {dimension_numbers = #tpu.dot_dimension_numbers<[1], [0], [0], [1], [0, 0, 1, 1], [], []>} : vector<200x128xf32>, vector<128x128xf32>, vector<200x128xf32> -> vector<200x128xf32>
      %c0_11 = arith.constant 0 : index
      %c0_12 = arith.constant 0 : index
      %10 = vector.load %arg6[%c0_11, %c0_12] : memref<200x128xf32, #tpu.memory_space<vmem>>, vector<200x128xf32>
      tpu.vector_store %arg6[%c0_11, %c0_12], %9 {strides = array<i32>} : memref<200x128xf32, #tpu.memory_space<vmem>>, vector<200x128xf32>,
    } else {
    }
    %c0 = arith.constant 0 : index
    %c0_1 = arith.constant 0 : index
    %3 = vector.load %arg6[%c0, %c0_1] : memref<200x128xf32, #tpu.memory_space<vmem>>, vector<200x128xf32>
    %c0_2 = arith.constant 0 : index
    %c0_3 = arith.constant 0 : index
    %4 = vector.load %arg4[%c0_2, %c0_3] : memref<128x128xf32, #tpu.memory_space<vmem>>, vector<128x128xf32>
    %cst = arith.constant dense<0.000000e+00> : vector<200x128xf32>
    %5 = tpu.matmul %3, %4, %cst {dimension_numbers = #tpu.dot_dimension_numbers<[1], [1], [0], [0], [0, 0, 1, 0], [], []>} : vector<200x128xf32>, vector<128x128xf32>, vector<200x128xf32> -> vector<200x128xf32>
    %c0_4 = arith.constant 0 : index
    %c0_5 = arith.constant 0 : index
    %6 = vector.load %arg5[%c0_4, %c0_5] : memref<200x128xf32, #tpu.memory_space<vmem>>, vector<200x128xf32>
    tpu.vector_store %arg5[%c0_4, %c0_5], %5 {strides = array<i32>} : memref<200x128xf32, #tpu.memory_space<vmem>>, vector<200x128xf32>,
    return
  }
  func.func @transform_0(%arg0: i32, %arg1: i32) -> (i32, i32) {
    %c0_i32 = arith.constant 0 : i32
    %c0_i32_0 = arith.constant 0 : i32
    return %arg0, %c0_i32 : i32, i32
  }
  func.func @transform_1(%arg0: i32, %arg1: i32) -> (i32, i32) {
    %c0_i32 = arith.constant 0 : i32
    %c0_i32_0 = arith.constant 0 : i32
    %c0_i32_1 = arith.constant 0 : i32
    return %c0_i32, %c0_i32_0 : i32, i32
  }
  func.func @transform_2(%arg0: i32, %arg1: i32) -> (i32, i32) {
    %c0_i32 = arith.constant 0 : i32
    %c0_i32_0 = arith.constant 0 : i32
    return %arg1, %c0_i32 : i32, i32
  }
  func.func @transform_3(%arg0: i32, %arg1: i32) -> (i32, i32) {
    %c0_i32 = arith.constant 0 : i32
    return %arg0, %arg1 : i32, i32
  }
}

</mosaic_0001>

<bundles_post_ra>
// kernel: tpu_custom_call.1
= control target key start
LH: loop header
LB: loop body
LE: loop exit
PB: predicated region body
PF: predicated region fallthrough
CT: control target
= control target key end

     0   :  { %s1311_s0 = inlined_call_operand.hbm [shape: f32[200,128], index: 0, kind: input, shape index: {}]   ;;  %s1312_s1 = inlined_call_operand.hbm [shape: f32[128,128], index: 1, kind: input, shape index: {}]   ;;  %s1313_s2 = inlined_call_operand.hbm [shape: f32[384,128], index: 2, kind: input, shape index: {}]   ;;  %s1314_s3 = inlined_call_operand.hbm [shape: f32[200,384], index: 3, kind: output, shape index: {}]  }
   0x1   :  { %1317 = sst [smem:[#allocation14_spill]] %s1311_s0 }
   0x2   :  { %8 = vsyncpa [#allocation4], 0 }
   0x3   :  { %9 = vsyncpa [#allocation7], 0 }
   0x4   :  { %10 = vsyncpa [#allocation5], 0 }
   0x5   :  { %12 = vsyncpa [#allocation5 + $0x1], 0  ;;  %s1101_s12 = smov 0   ;;  %s1103_s13 = smov 0  }
   0x6   :  { %s1105_s14 = smov 0   ;;  %s1107_s15 = smov 0  }
   0x7   :  { %s1109_s16 = smov 0   ;;  %s1111_s17 = smov 0  }
   0x8 LB: > { %s1132_s18 = sadd.s32 4294967295, %s1072_s17   ;;  %s690_s19 = sadd.s32 4294967294, %s1072_s17   ;;  %s1072_s17 = sphi %s1111_s17, %s18_s17   ;;  %s1068_s16 = sphi %s1109_s16, %s1330_s16   ;;  %s1064_s15 = sphi %s1107_s15, %s1329_s15   ;;  %s1060_s14 = sphi %s1105_s14, %s1328_s14   ;;  %s1056_s13 = sphi %s1103_s13, %s1327_s13   ;;  %s1052_s12 = sphi %s1101_s12, %s1326_s12  }
   0x9   : > { %p97_p0 = scmp.ne.s32.totalorder %s1056_s13, %s1052_s12  ;;  %p98_p1 = scmp.eq.s32.totalorder %s1132_s18, 0 }
   0xa   : > { %p123_p2 = scmp.eq.s32.totalorder %s1132_s18, 2  ;;  %p129_p3 = scmp.eq.s32.totalorder %s690_s19, 2 }
   0xb   : > { %p1141_p4 = por %p98_p1, %p97_p0  ;;  %p691_p5 = scmp.ge.s32.totalorder %s1072_s17, 1 }
   0xc   : > { %p1146_p6 = por %p129_p3, %p97_p0  ;;  %p136_p7 = scmp.lt.s32.totalorder %s1072_s17, 4 }
   0xd   : > { %s1320_s0 = sld [smem:[#allocation14_spill]]  ;;  %s1074_s26 = smov [#allocation3]  }
   0xe   : > { %p1154_p8 = pnand %p691_p5, %p136_p7  ;;  %s152_s27 = sshll.u32 %s1074_s26, 4  ;;  %s153_s27 = int_to_ptr.vmem [resolvable:$true] %s152_s27 }
   0xf   : > { %s164_s30 = sshll.u32 %s1312_s1, 4  ;;  %s1315_s4 = smov 128   ;;  %s165_s30 = int_to_ptr.hbm [resolvable:$true] %s164_s30 }
  0x10   : > { %p816_p9 = pneg %p1154_p8  ;;  %s1316_s5 = smov 8  }
  0x11   : > { %s1077_s6 = smov [#allocation6]   ;;  %s27_s8 = sadd.s32 1, %s1068_s16 }
  0x12   : > { %p817_p10 = pnand %p816_p9, %p98_p1  ;;  %s166_s7 = sshll.u32 %s1077_s6, 4  ;;  %s167_s7 = int_to_ptr.vmem [resolvable:$true] %s166_s7 }
  0x13   : > { %s150_s24 = sshll.u32 %s1320_s0, 4  ;;  %s84_s9 = sadd.s32 1, %s1060_s14  ;;  %s151_s24 = int_to_ptr.hbm [resolvable:$true] %s150_s24 }
  0x14   : > { %819 = dma.hbm_to_vmem [thread:$0]  (!%p817_p10), %s151_s24, 3200, %s153_s27, [#allocation4], %s1315_s4, %s1315_s4, %s1316_s5  }
  0x15   : > { %822 = dma.hbm_to_vmem [thread:$0]  (!%p817_p10), %s165_s30, 2048, %s167_s7, [#allocation7], %s1315_s4, %s1315_s4, %s1316_s5  }
  0x16   : > { %p28_p11 = scmp.ge.s32.totalorder %s27_s8, 3  ;;  %p91_p12 = scmp.ne.s32.totalorder %s1060_s14, %s1056_s13 }
  0x17   : > { %p92_p13 = scmp.eq.s32.totalorder %s1072_s17, 0  ;;  %p833_p0 = scmp.lt.s32.totalorder %s1072_s17, 3 }
  0x18   : > { %s1332_s8 = smov (%p28_p11, %s27_s8), 0  ;;  %p1185_p5 = por %p123_p2, %p91_p12 }
  0x19   : > { %p1179_p3 = por %p92_p13, %p91_p12  ;;  %s81_s19 = ssub.s32 %s1068_s16, %s1332_s8 }
  0x1a   : > { %s180_s22 = sand.u32 1, %s1072_s17   ;;  %p82_p7 = scmp.eq.s32.totalorder %s81_s19, 0 }
  0x1b   : > { %s182_s23 = sand.u32 1, %s1060_s14   ;;  %s706_s24 = sshll.u32 %s1068_s16, 7 }
  0x1c   : > { %s1195_s26 = scalar_select %p82_p7, %s1060_s14, %s84_s9  }
  0x1d   : > { %s695_s27 = sshll.u32 %s182_s23, 7  ;;  %s189_s30 = scalar_lea.hbm %s1313_s2, %s706_s24 }
  0x1e   : > { %s190_s6 = sshll.u32 %s189_s30, 4  ;;  %s184_s7 = scalar_lea.vmem [#allocation8], %s695_s27  ;;  %s191_s6 = int_to_ptr.hbm [resolvable:$true] %s190_s6 }
  0x1f   : > { %s192_s4 = sshll.u32 %s184_s7, 4  ;;  %p824_p2 = pnand %p833_p0, %p1179_p3  ;;  %s193_s4 = int_to_ptr.vmem [resolvable:$true] %s192_s4 }
  0x20   : > { %s181_s5 = scalar_lea.sflag [#allocation4], %s180_s22  ;;  %s1324_s0 = smov 8  }
  0x21   : > { %s1325_s19 = smov 128   ;;  %204 = sbr.rel (%p1154_p8) target bundleno = 516 (0x204), region = 32 }
  0x22   : > { %826 = dma.hbm_to_vmem [thread:$0]  (!%p824_p2), %s191_s6, 2048, %s193_s4, %s181_s5, %s1325_s19, %s1325_s19, %s1324_s0  }
  0x26   : > { %1035 = dma.done.wait (%p98_p1), [#allocation4], 3200  }
  0x27   : > { %1037 = vsyncadd (%p98_p1), [#allocation4], 4294964096 }
  0x28   : > { %1039 = dma.done.wait (%p98_p1), [#allocation7], 2048  }
  0x29   : > { %1041 = vsyncadd (%p98_p1), [#allocation7], 4294965248  ;;  %s216_s9 = sand.u32 1, %s1132_s18   ;;  %s1219_s0 = sand.u32 1, %s1056_s13  }
  0x2a   : > { %s701_s25 = sshll.u32 %s1219_s0, 7  ;;  %s217_s4 = scalar_lea.sflag [#allocation4], %s216_s9 }
  0x2b   : > { %s1222_s5 = scalar_lea.vmem [#allocation8], %s701_s25 }
  0x2c   : > { %1043 = dma.done.wait (%p1141_p4), %s217_s4, 2048  }
  0x2d   : > { %1045 = vsyncadd (%p1141_p4), %s217_s4, 4294965248  ;;  %s803_s10 = smul.u32 200, %s1219_s0  ;;  %p702_p1 = scmp.ne.s32.totalorder %s1064_s15, 0 }
  0x2f   : > { %s1229_s22 = scalar_lea.vmem [#allocation9], %s803_s10  ;;  %250 = sbr.rel (%p702_p1) target bundleno = 266 (0x10a), region = 48 }
  0x34   : > { %v291_v0 = vld [vmem:[#allocation6 + $0x78] sm:$0xff]  ;;  %v290_v1 = vld [vmem:[#allocation6 + $0x70] sm:$0xff]  ;;  %v289_v2 = vld [vmem:[#allocation6 + $0x68] sm:$0xff] }
  0x35   : > { %708 = vmatpush.msra.mxu2 %v291_v0  ;;  %709 = vmatpush.msra.mxu3 %v291_v0  ;;  %v288_v3 = vld [vmem:[#allocation6 + $0x60] sm:$0xff]  ;;  %v287_v4 = vld [vmem:[#allocation6 + $0x58] sm:$0xff]  ;;  %v286_v5 = vld [vmem:[#allocation6 + $0x50] sm:$0xff] }
  0x36   : > { %707 = vmatpush.msra.mxu1 %v291_v0  ;;  %292 = vmatpush.msra.mxu0 %v291_v0  ;;  %v285_v6 = vld [vmem:[#allocation6 + $0x48] sm:$0xff]  ;;  %v284_v7 = vld [vmem:[#allocation6 + $0x40] sm:$0xff]  ;;  %v283_v8 = vld [vmem:[#allocation6 + $0x38] sm:$0xff] }
  0x37   : > { %711 = vmatpush.msra.mxu2 %v290_v1  ;;  %712 = vmatpush.msra.mxu3 %v290_v1  ;;  %v282_v9 = vld [vmem:[#allocation6 + $0x30] sm:$0xff]  ;;  %v281_v10 = vld [vmem:[#allocation6 + $0x28] sm:$0xff]  ;;  %v280_v11 = vld [vmem:[#allocation6 + $0x20] sm:$0xff] }
  0x38   : > { %710 = vmatpush.msra.mxu1 %v290_v1  ;;  %293 = vmatpush.msra.mxu0 %v290_v1  ;;  %v279_v12 = vld [vmem:[#allocation6 + $0x18] sm:$0xff]  ;;  %v278_v13 = vld [vmem:[#allocation6 + $0x10] sm:$0xff]  ;;  %v277_v14 = vld [vmem:[#allocation6 + $0x8] sm:$0xff] }
  0x39   : > { %714 = vmatpush.msra.mxu2 %v289_v2  ;;  %715 = vmatpush.msra.mxu3 %v289_v2  ;;  %v276_v15 = vld [vmem:[#allocation6] sm:$0xff]  ;;  %v262_v16 = vld [vmem:[#allocation3 + $0x58] sm:$0xff]  ;;  %v269_v17 = vld [vmem:[#allocation3 + $0x90] sm:$0xff] }
  0x3a   : > { %713 = vmatpush.msra.mxu1 %v289_v2  ;;  %294 = vmatpush.msra.mxu0 %v289_v2  ;;  %v256_v18 = vld [vmem:[#allocation3 + $0x28] sm:$0xff]  ;;  %v251_v19 = vld [vmem:[#allocation3] sm:$0xff]  ;;  %v270_v21 = vld [vmem:[#allocation3 + $0x98] sm:$0xff] }
  0x3b   : > { %717 = vmatpush.msra.mxu2 %v288_v3  ;;  %718 = vmatpush.msra.mxu3 %v288_v3  ;;  %v263_v20 = vld [vmem:[#allocation3 + $0x60] sm:$0xff]  ;;  %v257_v22 = vld [vmem:[#allocation3 + $0x30] sm:$0xff]  ;;  %v252_v23 = vld [vmem:[#allocation3 + $0x8] sm:$0xff] }
  0x3c   : > { %716 = vmatpush.msra.mxu1 %v288_v3  ;;  %295 = vmatpush.msra.mxu0 %v288_v3  ;;  %v264_v24 = vld [vmem:[#allocation3 + $0x68] sm:$0xff]  ;;  %v271_v25 = vld [vmem:[#allocation3 + $0xa0] sm:$0xff]  ;;  %v258_v26 = vld [vmem:[#allocation3 + $0x38] sm:$0xff] }
  0x3d   : > { %720 = vmatpush.msra.mxu2 %v287_v4  ;;  %721 = vmatpush.msra.mxu3 %v287_v4  ;;  %v253_v27 = vld [vmem:[#allocation3 + $0x10] sm:$0xff]  ;;  %v272_v29 = vld [vmem:[#allocation3 + $0xa8] sm:$0xff]  ;;  %v259_v30 = vld [vmem:[#allocation3 + $0x40] sm:$0xff] }
  0x3e   : > { %719 = vmatpush.msra.mxu1 %v287_v4  ;;  %296 = vmatpush.msra.mxu0 %v287_v4  ;;  %v265_v28 = vld [vmem:[#allocation3 + $0x70] sm:$0xff]  ;;  %v254_v31 = vld [vmem:[#allocation3 + $0x18] sm:$0xff]  ;;  %v260_v34 = vld [vmem:[#allocation3 + $0x48] sm:$0xff] }
  0x3f   : > { %723 = vmatpush.msra.mxu2 %v286_v5  ;;  %724 = vmatpush.msra.mxu3 %v286_v5  ;;  %v266_v32 = vld [vmem:[#allocation3 + $0x78] sm:$0xff]  ;;  %v273_v33 = vld [vmem:[#allocation3 + $0xb0] sm:$0xff]  ;;  %v255_v35 = vld [vmem:[#allocation3 + $0x20] sm:$0xff] }
  0x40   : > { %722 = vmatpush.msra.mxu1 %v286_v5  ;;  %297 = vmatpush.msra.mxu0 %v286_v5  ;;  %v267_v36 = vld [vmem:[#allocation3 + $0x80] sm:$0xff]  ;;  %v274_v37 = vld [vmem:[#allocation3 + $0xb8] sm:$0xff]  ;;  %v261_v38 = vld [vmem:[#allocation3 + $0x50] sm:$0xff] }
  0x41   : > { %726 = vmatpush.msra.mxu2 %v285_v6  ;;  %727 = vmatpush.msra.mxu3 %v285_v6  ;;  %v268_v39 = vld [vmem:[#allocation3 + $0x88] sm:$0xff]  ;;  %v275_v40 = vld [vmem:[#allocation3 + $0xc0] sm:$0xff] }
  0x42   : > { %725 = vmatpush.msra.mxu1 %v285_v6  ;;  %298 = vmatpush.msra.mxu0 %v285_v6 }
  0x43   : > { %729 = vmatpush.msra.mxu2 %v284_v7  ;;  %730 = vmatpush.msra.mxu3 %v284_v7 }
  0x44   : > { %728 = vmatpush.msra.mxu1 %v284_v7  ;;  %299 = vmatpush.msra.mxu0 %v284_v7 }
  0x45   : > { %732 = vmatpush.msra.mxu2 %v283_v8  ;;  %733 = vmatpush.msra.mxu3 %v283_v8 }
  0x46   : > { %731 = vmatpush.msra.mxu1 %v283_v8  ;;  %300 = vmatpush.msra.mxu0 %v283_v8 }
  0x47   : > { %735 = vmatpush.msra.mxu2 %v282_v9  ;;  %736 = vmatpush.msra.mxu3 %v282_v9 }
  0x48   : > { %734 = vmatpush.msra.mxu1 %v282_v9  ;;  %301 = vmatpush.msra.mxu0 %v282_v9 }
  0x49   : > { %738 = vmatpush.msra.mxu2 %v281_v10  ;;  %739 = vmatpush.msra.mxu3 %v281_v10 }
  0x4a   : > { %737 = vmatpush.msra.mxu1 %v281_v10  ;;  %302 = vmatpush.msra.mxu0 %v281_v10 }
  0x4b   : > { %741 = vmatpush.msra.mxu2 %v280_v11  ;;  %742 = vmatpush.msra.mxu3 %v280_v11 }
  0x4c   : > { %740 = vmatpush.msra.mxu1 %v280_v11  ;;  %303 = vmatpush.msra.mxu0 %v280_v11 }
  0x4d   : > { %744 = vmatpush.msra.mxu2 %v279_v12  ;;  %745 = vmatpush.msra.mxu3 %v279_v12 }
  0x4e   : > { %743 = vmatpush.msra.mxu1 %v279_v12  ;;  %304 = vmatpush.msra.mxu0 %v279_v12 }
  0x4f   : > { %747 = vmatpush.msra.mxu2 %v278_v13  ;;  %748 = vmatpush.msra.mxu3 %v278_v13 }
  0x50   : > { %746 = vmatpush.msra.mxu1 %v278_v13  ;;  %305 = vmatpush.msra.mxu0 %v278_v13 }
  0x51   : > { %750 = vmatpush.msra.mxu2 %v277_v14  ;;  %751 = vmatpush.msra.mxu3 %v277_v14 }
  0x52   : > { %749 = vmatpush.msra.mxu1 %v277_v14  ;;  %306 = vmatpush.msra.mxu0 %v277_v14 }
  0x53   : > { %753 = vmatpush.msra.mxu2 %v276_v15  ;;  %754 = vmatpush.msra.mxu3 %v276_v15 }
  0x54   : > { %341 = vmatmul.f32.vlgmr.msra.gmra.mxu2 %v262_v16  ;;  %362 = vmatmul.f32.vlgmr.msra.gmra.mxu3 %v269_v17 }
  0x55   : > { %752 = vmatpush.msra.mxu1 %v276_v15  ;;  %307 = vmatpush.msra.mxu0 %v276_v15 }
  0x56   : > { %323 = vmatmul.f32.vlgmr.msra.gmra.mxu1 %v256_v18  ;;  %308 = vmatmul.f32.vlgmr.msra.gmra.mxu0 %v251_v19 }
  0x5c   : > { %344 = vmatmul.f32.gmra.mxu2 %v263_v20  ;;  %365 = vmatmul.f32.gmra.mxu3 %v270_v21 }
  0x5e   : > { %326 = vmatmul.f32.gmra.mxu1 %v257_v22  ;;  %311 = vmatmul.f32.gmra.mxu0 %v252_v23 }
  0x64   : > { %347 = vmatmul.f32.gmra.mxu2 %v264_v24  ;;  %368 = vmatmul.f32.gmra.mxu3 %v271_v25 }
  0x66   : > { %329 = vmatmul.f32.gmra.mxu1 %v258_v26  ;;  %314 = vmatmul.f32.gmra.mxu0 %v253_v27 }
  0x6c   : > { %350 = vmatmul.f32.gmra.mxu2 %v265_v28  ;;  %371 = vmatmul.f32.gmra.mxu3 %v272_v29 }
  0x6e   : > { %332 = vmatmul.f32.gmra.mxu1 %v259_v30  ;;  %317 = vmatmul.f32.gmra.mxu0 %v254_v31 }
  0x74   : > { %353 = vmatmul.f32.gmra.mxu2 %v266_v32  ;;  %374 = vmatmul.f32.gmra.mxu3 %v273_v33 }
  0x76   : > { %335 = vmatmul.f32.gmra.mxu1 %v260_v34  ;;  %320 = vmatmul.f32.gmra.mxu0 %v255_v35 }
  0x7c   : > { %356 = vmatmul.f32.gmra.mxu2 %v267_v36  ;;  %377 = vmatmul.f32.gmra.mxu3 %v274_v37 }
  0x7e   : > { %338 = vmatmul.f32.gmra.mxu1 %v261_v38 }
  0x84   : > { %359 = vmatmul.f32.gmra.mxu2 %v268_v39  ;;  %380 = vmatmul.f32.gmra.mxu3 %v275_v40 }
  0xd3   : > { %v324_v41 = vpop.f32.mrf.mxu1  ;;  %v309_v42 = vpop.f32.mrf.mxu0 }
  0xd4   : > { %389 = vst [vmem:[#allocation2 + $0x28] sm:$0xff] %v324_v41 }
  0xd5   : > { %384 = vst [vmem:[#allocation2 + $0xb0] sm:$0xff] %v309_v42 }
  0xd7   : > { %v342_v43 = vpop.f32.mrf.mxu2  ;;  %v363_v44 = vpop.f32.mrf.mxu3 }
  0xd8   : > { %395 = vst [vmem:[#allocation2 + $0x70] sm:$0xff] %v342_v43 }
  0xd9   : > { %402 = vst [vmem:[#allocation2 + $0x90] sm:$0xff] %v363_v44 }
  0xdb   : > { %v327_v45 = vpop.f32.mrf.mxu1  ;;  %v312_v46 = vpop.f32.mrf.mxu0 }
  0xdc   : > { %390 = vst [vmem:[#allocation2 + $0x40] sm:$0xff] %v327_v45 }
  0xdd   : > { %385 = vst [vmem:[#allocation2] sm:$0xff] %v312_v46 }
  0xdf   : > { %v345_v47 = vpop.f32.mrf.mxu2  ;;  %v366_v48 = vpop.f32.mrf.mxu3 }
  0xe0   : > { %396 = vst [vmem:[#allocation2 + $0x18] sm:$0xff] %v345_v47 }
  0xe1   : > { %403 = vst [vmem:[#allocation2 + $0x38] sm:$0xff] %v366_v48 }
  0xe3   : > { %v330_v49 = vpop.f32.mrf.mxu1  ;;  %v315_v50 = vpop.f32.mrf.mxu0 }
  0xe4   : > { %391 = vst [vmem:[#allocation2 + $0x78] sm:$0xff] %v330_v49 }
  0xe5   : > { %386 = vst [vmem:[#allocation2 + $0x10] sm:$0xff] %v315_v50 }
  0xe7   : > { %v348_v51 = vpop.f32.mrf.mxu2  ;;  %v369_v52 = vpop.f32.mrf.mxu3 }
  0xe8   : > { %397 = vst [vmem:[#allocation2 + $0x68] sm:$0xff] %v348_v51 }
  0xe9   : > { %404 = vst [vmem:[#allocation2 + $0x58] sm:$0xff] %v369_v52 }
  0xeb   : > { %v333_v53 = vpop.f32.mrf.mxu1  ;;  %v318_v54 = vpop.f32.mrf.mxu0 }
  0xec   : > { %392 = vst [vmem:[#allocation2 + $0x80] sm:$0xff] %v333_v53 }
  0xed   : > { %387 = vst [vmem:[#allocation2 + $0x48] sm:$0xff] %v318_v54 }
  0xef   : > { %v351_v55 = vpop.f32.mrf.mxu2  ;;  %v372_v56 = vpop.f32.mrf.mxu3 }
  0xf0   : > { %398 = vst [vmem:[#allocation2 + $0x98] sm:$0xff] %v351_v55 }
  0xf1   : > { %405 = vst [vmem:[#allocation2 + $0x50] sm:$0xff] %v372_v56 }
  0xf3   : > { %v336_v57 = vpop.f32.mrf.mxu1  ;;  %v321_v58 = vpop.f32.mrf.mxu0 }
  0xf4   : > { %393 = vst [vmem:[#allocation2 + $0x88] sm:$0xff] %v336_v57 }
  0xf5   : > { %388 = vst [vmem:[#allocation2 + $0x60] sm:$0xff] %v321_v58 }
  0xf7   : > { %v354_v59 = vpop.f32.mrf.mxu2  ;;  %v375_v60 = vpop.f32.mrf.mxu3 }
  0xf8   : > { %399 = vst [vmem:[#allocation2 + $0xa0] sm:$0xff] %v354_v59 }
  0xf9   : > { %406 = vst [vmem:[#allocation2 + $0x8] sm:$0xff] %v375_v60 }
  0xfb   : > { %v339_v61 = vpop.f32.mrf.mxu1 }
  0xfc   : > { %394 = vst [vmem:[#allocation2 + $0xb8] sm:$0xff] %v339_v61 }
  0xff   : > { %v357_v62 = vpop.f32.mrf.mxu2  ;;  %v378_v63 = vpop.f32.mrf.mxu3 }
 0x100   : > { %400 = vst [vmem:[#allocation2 + $0x20] sm:$0xff] %v357_v62 }
 0x101   : > { %407 = vst [vmem:[#allocation2 + $0xa8] sm:$0xff] %v378_v63 }
 0x107   : > { %v360_v0 = vpop.f32.mrf.mxu2  ;;  %v381_v1 = vpop.f32.mrf.mxu3 }
 0x108   : > { %401 = vst [vmem:[#allocation2 + $0x30] sm:$0xff] %v360_v0 }
 0x109   : > { %408 = vst [vmem:[#allocation2 + $0xc0] sm:$0xff] %v381_v1 }
 0x10a PF: > { %v449_v2 = vld [vmem:[%s1222_s5 + $0x78] sm:$0xff]  ;;  %v448_v3 = vld [vmem:[%s1222_s5 + $0x70] sm:$0xff]  ;;  %v447_v4 = vld [vmem:[%s1222_s5 + $0x68] sm:$0xff]  ;;  %s703_s18 = sshll.u32 %s1064_s15, 3  ;;  %s582_s27 = sshll.u32 %s1229_s22, 4  ;;  %s583_s27 = int_to_ptr.vmem [resolvable:$true] %s582_s27 }
 0x10b   : > { %756 = vmatpush.xpose.msra.mxu2 %v449_v2  ;;  %757 = vmatpush.xpose.msra.mxu3 %v449_v2  ;;  %v446_v5 = vld [vmem:[%s1222_s5 + $0x60] sm:$0xff]  ;;  %v445_v6 = vld [vmem:[%s1222_s5 + $0x58] sm:$0xff]  ;;  %v444_v7 = vld [vmem:[%s1222_s5 + $0x50] sm:$0xff]  ;;  %s581_s24 = scalar_lea.hbm %s1314_s3, %s703_s18  ;;  %s568_s29 = scalar_lea.sflag [#allocation5], %s1219_s0 }
 0x10c   : > { %450 = vmatpush.xpose.msra.mxu0 %v449_v2  ;;  %755 = vmatpush.xpose.msra.mxu1 %v449_v2  ;;  %v443_v8 = vld [vmem:[%s1222_s5 + $0x48] sm:$0xff]  ;;  %v442_v9 = vld [vmem:[%s1222_s5 + $0x40] sm:$0xff]  ;;  %v441_v10 = vld [vmem:[%s1222_s5 + $0x38] sm:$0xff]  ;;  %s584_s28 = sshll.u32 %s581_s24, 4  ;;  %s1002_s19 = scalar_lea.hbm %s1314_s3, 600  ;;  %s585_s28 = int_to_ptr.hbm [resolvable:$true] %s584_s28 }
 0x10d   : > { %v440_v11 = vld [vmem:[%s1222_s5 + $0x30] sm:$0xff]  ;;  %v439_v12 = vld [vmem:[%s1222_s5 + $0x28] sm:$0xff]  ;;  %v438_v13 = vld [vmem:[%s1222_s5 + $0x20] sm:$0xff]  ;;  %s996_s30 = sshra.s32 %s585_s28, 4  ;;  %s997_s30 = int_to_ptr.hbm [resolvable:$true] %s996_s30 }
 0x10e   : > { %v437_v14 = vld [vmem:[%s1222_s5 + $0x18] sm:$0xff]  ;;  %v436_v15 = vld [vmem:[%s1222_s5 + $0x10] sm:$0xff]  ;;  %v435_v16 = vld [vmem:[%s1222_s5 + $0x8] sm:$0xff]  ;;  %s998_s15 = scalar_lea.hbm %s997_s30, 200  ;;  %p1003_p10 = scmp.lt.s32.totalorder %s997_s30, %s1314_s3 }
 0x10f   : > { %759 = vmatpush.xpose.msra.mxu2 %v448_v3  ;;  %760 = vmatpush.xpose.msra.mxu3 %v448_v3  ;;  %v434_v17 = vld [vmem:[%s1222_s5] sm:$0xff]  ;;  %v415_v21 = vld [vmem:[#allocation2 + $0x40] sm:$0xff]  ;;  %v421_v22 = vld [vmem:[#allocation2 + $0x18] sm:$0xff]  ;;  %p999_p4 = scmp.ne.s32.totalorder %s997_s30, %s998_s15  ;;  %p1004_p11 = scmp.lt.s32.totalorder %s1002_s19, %s998_s15 }
 0x110   : > { %451 = vmatpush.xpose.msra.mxu0 %v448_v3  ;;  %758 = vmatpush.xpose.msra.mxu1 %v448_v3  ;;  %v420_v18 = vld [vmem:[#allocation2 + $0x70] sm:$0xff]  ;;  %v428_v23 = vld [vmem:[#allocation2 + $0x38] sm:$0xff]  ;;  %v410_v24 = vld [vmem:[#allocation2] sm:$0xff] }
 0x111   : > { %v427_v19 = vld [vmem:[#allocation2 + $0x90] sm:$0xff]  ;;  %v416_v25 = vld [vmem:[#allocation2 + $0x78] sm:$0xff]  ;;  %v422_v26 = vld [vmem:[#allocation2 + $0x68] sm:$0xff]  ;;  %p1000_p8 = pnand %p999_p4, %p1185_p5  ;;  %p1005_p12 = por %p1004_p11, %p1003_p10 }
 0x112   : > { %v409_v20 = vld [vmem:[#allocation2 + $0xb0] sm:$0xff]  ;;  %v429_v27 = vld [vmem:[#allocation2 + $0x58] sm:$0xff]  ;;  %v417_v29 = vld [vmem:[#allocation2 + $0x80] sm:$0xff] }
 0x113   : > { %762 = vmatpush.xpose.msra.mxu2 %v447_v4  ;;  %763 = vmatpush.xpose.msra.mxu3 %v447_v4  ;;  %v411_v28 = vld [vmem:[#allocation2 + $0x10] sm:$0xff]  ;;  %v423_v30 = vld [vmem:[#allocation2 + $0x98] sm:$0xff]  ;;  %v412_v32 = vld [vmem:[#allocation2 + $0x48] sm:$0xff]  ;;  %p1001_p9 = pneg %p1000_p8 }
 0x114   : > { %452 = vmatpush.xpose.msra.mxu0 %v447_v4  ;;  %761 = vmatpush.xpose.msra.mxu1 %v447_v4  ;;  %v430_v31 = vld [vmem:[#allocation2 + $0x50] sm:$0xff]  ;;  %v418_v33 = vld [vmem:[#allocation2 + $0x88] sm:$0xff]  ;;  %v424_v34 = vld [vmem:[#allocation2 + $0xa0] sm:$0xff] }
 0x115   : > { %v431_v35 = vld [vmem:[#allocation2 + $0x8] sm:$0xff]  ;;  %v413_v36 = vld [vmem:[#allocation2 + $0x60] sm:$0xff]  ;;  %v419_v37 = vld [vmem:[#allocation2 + $0xb8] sm:$0xff]  ;;  %p1006_p13 = pnand %p1005_p12, %p1001_p9 }
 0x116   : > { %v425_v38 = vld [vmem:[#allocation2 + $0x20] sm:$0xff]  ;;  %v432_v39 = vld [vmem:[#allocation2 + $0xa8] sm:$0xff]  ;;  %v426_v41 = vld [vmem:[#allocation2 + $0x30] sm:$0xff] }
 0x117   : > { %765 = vmatpush.xpose.msra.mxu2 %v446_v5  ;;  %766 = vmatpush.xpose.msra.mxu3 %v446_v5  ;;  %v414_v40 = vld [vmem:[#allocation2 + $0x28] sm:$0xff]  ;;  %v433_v42 = vld [vmem:[#allocation2 + $0xc0] sm:$0xff] }
 0x118   : > { %453 = vmatpush.xpose.msra.mxu0 %v446_v5  ;;  %764 = vmatpush.xpose.msra.mxu1 %v446_v5 }
 0x11b   : > { %768 = vmatpush.xpose.msra.mxu2 %v445_v6  ;;  %769 = vmatpush.xpose.msra.mxu3 %v445_v6 }
 0x11c   : > { %454 = vmatpush.xpose.msra.mxu0 %v445_v6  ;;  %767 = vmatpush.xpose.msra.mxu1 %v445_v6 }
 0x11f   : > { %771 = vmatpush.xpose.msra.mxu2 %v444_v7  ;;  %772 = vmatpush.xpose.msra.mxu3 %v444_v7 }
 0x120   : > { %455 = vmatpush.xpose.msra.mxu0 %v444_v7  ;;  %770 = vmatpush.xpose.msra.mxu1 %v444_v7 }
 0x123   : > { %774 = vmatpush.xpose.msra.mxu2 %v443_v8  ;;  %775 = vmatpush.xpose.msra.mxu3 %v443_v8 }
 0x124   : > { %456 = vmatpush.xpose.msra.mxu0 %v443_v8  ;;  %773 = vmatpush.xpose.msra.mxu1 %v443_v8 }
 0x127   : > { %777 = vmatpush.xpose.msra.mxu2 %v442_v9  ;;  %778 = vmatpush.xpose.msra.mxu3 %v442_v9 }
 0x128   : > { %457 = vmatpush.xpose.msra.mxu0 %v442_v9  ;;  %776 = vmatpush.xpose.msra.mxu1 %v442_v9 }
 0x12b   : > { %780 = vmatpush.xpose.msra.mxu2 %v441_v10  ;;  %781 = vmatpush.xpose.msra.mxu3 %v441_v10 }
 0x12c   : > { %458 = vmatpush.xpose.msra.mxu0 %v441_v10  ;;  %779 = vmatpush.xpose.msra.mxu1 %v441_v10 }
 0x12f   : > { %783 = vmatpush.xpose.msra.mxu2 %v440_v11  ;;  %784 = vmatpush.xpose.msra.mxu3 %v440_v11 }
 0x130   : > { %459 = vmatpush.xpose.msra.mxu0 %v440_v11  ;;  %782 = vmatpush.xpose.msra.mxu1 %v440_v11 }
 0x133   : > { %786 = vmatpush.xpose.msra.mxu2 %v439_v12  ;;  %787 = vmatpush.xpose.msra.mxu3 %v439_v12 }
 0x134   : > { %460 = vmatpush.xpose.msra.mxu0 %v439_v12  ;;  %785 = vmatpush.xpose.msra.mxu1 %v439_v12 }
 0x137   : > { %789 = vmatpush.xpose.msra.mxu2 %v438_v13  ;;  %790 = vmatpush.xpose.msra.mxu3 %v438_v13 }
 0x138   : > { %461 = vmatpush.xpose.msra.mxu0 %v438_v13  ;;  %788 = vmatpush.xpose.msra.mxu1 %v438_v13 }
 0x13b   : > { %792 = vmatpush.xpose.msra.mxu2 %v437_v14  ;;  %793 = vmatpush.xpose.msra.mxu3 %v437_v14 }
 0x13c   : > { %462 = vmatpush.xpose.msra.mxu0 %v437_v14  ;;  %791 = vmatpush.xpose.msra.mxu1 %v437_v14 }
 0x13f   : > { %795 = vmatpush.xpose.msra.mxu2 %v436_v15  ;;  %796 = vmatpush.xpose.msra.mxu3 %v436_v15 }
 0x140   : > { %463 = vmatpush.xpose.msra.mxu0 %v436_v15  ;;  %794 = vmatpush.xpose.msra.mxu1 %v436_v15 }
 0x143   : > { %798 = vmatpush.xpose.msra.mxu2 %v435_v16  ;;  %799 = vmatpush.xpose.msra.mxu3 %v435_v16 }
 0x144   : > { %464 = vmatpush.xpose.msra.mxu0 %v435_v16  ;;  %797 = vmatpush.xpose.msra.mxu1 %v435_v16 }
 0x147   : > { %801 = vmatpush.xpose.msra.mxu2 %v434_v17  ;;  %802 = vmatpush.xpose.msra.mxu3 %v434_v17 }
 0x148   : > { %465 = vmatpush.xpose.msra.mxu0 %v434_v17  ;;  %800 = vmatpush.xpose.msra.mxu1 %v434_v17 }
 0x14a   : > { %499 = vmatmul.f32.vlgmr.msra.gmra.mxu2 %v420_v18  ;;  %520 = vmatmul.f32.vlgmr.msra.gmra.mxu3 %v427_v19 }
 0x14b   : > { %466 = vmatmul.f32.vlgmr.msra.gmra.mxu0 %v409_v20  ;;  %484 = vmatmul.f32.vlgmr.msra.gmra.mxu1 %v415_v21 }
 0x152   : > { %502 = vmatmul.f32.gmra.mxu2 %v421_v22  ;;  %523 = vmatmul.f32.gmra.mxu3 %v428_v23 }
 0x153   : > { %469 = vmatmul.f32.gmra.mxu0 %v410_v24  ;;  %487 = vmatmul.f32.gmra.mxu1 %v416_v25 }
 0x15a   : > { %505 = vmatmul.f32.gmra.mxu2 %v422_v26  ;;  %526 = vmatmul.f32.gmra.mxu3 %v429_v27 }
 0x15b   : > { %472 = vmatmul.f32.gmra.mxu0 %v411_v28  ;;  %490 = vmatmul.f32.gmra.mxu1 %v417_v29 }
 0x162   : > { %508 = vmatmul.f32.gmra.mxu2 %v423_v30  ;;  %529 = vmatmul.f32.gmra.mxu3 %v430_v31 }
 0x163   : > { %475 = vmatmul.f32.gmra.mxu0 %v412_v32  ;;  %493 = vmatmul.f32.gmra.mxu1 %v418_v33 }
 0x16a   : > { %511 = vmatmul.f32.gmra.mxu2 %v424_v34  ;;  %532 = vmatmul.f32.gmra.mxu3 %v431_v35 }
 0x16b   : > { %478 = vmatmul.f32.gmra.mxu0 %v413_v36  ;;  %496 = vmatmul.f32.gmra.mxu1 %v419_v37 }
 0x172   : > { %514 = vmatmul.f32.gmra.mxu2 %v425_v38  ;;  %535 = vmatmul.f32.gmra.mxu3 %v432_v39 }
 0x173   : > { %481 = vmatmul.f32.gmra.mxu0 %v414_v40 }
 0x17a   : > { %517 = vmatmul.f32.gmra.mxu2 %v426_v41  ;;  %538 = vmatmul.f32.gmra.mxu3 %v433_v42 }
 0x1c8   : > { %v467_v43 = vpop.f32.mrf.mxu0  ;;  %v485_v44 = vpop.f32.mrf.mxu1 }
 0x1c9   : > { %542 = vst [vmem:[%s1229_s22] sm:$0xff] %v467_v43 }
 0x1ca   : > { %548 = vst [vmem:[%s1229_s22 + $0x30] sm:$0xff] %v485_v44 }
 0x1cd   : > { %v500_v45 = vpop.f32.mrf.mxu2  ;;  %v521_v46 = vpop.f32.mrf.mxu3 }
 0x1ce   : > { %553 = vst [vmem:[%s1229_s22 + $0x58] sm:$0xff] %v500_v45 }
 0x1cf   : > { %560 = vst [vmem:[%s1229_s22 + $0x90] sm:$0xff] %v521_v46 }
 0x1d0   : > { %v470_v47 = vpop.f32.mrf.mxu0  ;;  %v488_v48 = vpop.f32.mrf.mxu1 }
 0x1d1   : > { %543 = vst [vmem:[%s1229_s22 + $0x8] sm:$0xff] %v470_v47 }
 0x1d2   : > { %549 = vst [vmem:[%s1229_s22 + $0x38] sm:$0xff] %v488_v48 }
 0x1d5   : > { %v503_v49 = vpop.f32.mrf.mxu2  ;;  %v524_v50 = vpop.f32.mrf.mxu3 }
 0x1d6   : > { %554 = vst [vmem:[%s1229_s22 + $0x60] sm:$0xff] %v503_v49 }
 0x1d7   : > { %561 = vst [vmem:[%s1229_s22 + $0x98] sm:$0xff] %v524_v50 }
 0x1d8   : > { %v473_v51 = vpop.f32.mrf.mxu0  ;;  %v491_v52 = vpop.f32.mrf.mxu1 }
 0x1d9   : > { %544 = vst [vmem:[%s1229_s22 + $0x10] sm:$0xff] %v473_v51 }
 0x1da   : > { %550 = vst [vmem:[%s1229_s22 + $0x40] sm:$0xff] %v491_v52 }
 0x1dd   : > { %v506_v53 = vpop.f32.mrf.mxu2  ;;  %v527_v54 = vpop.f32.mrf.mxu3 }
 0x1de   : > { %555 = vst [vmem:[%s1229_s22 + $0x68] sm:$0xff] %v506_v53 }
 0x1df   : > { %562 = vst [vmem:[%s1229_s22 + $0xa0] sm:$0xff] %v527_v54 }
 0x1e0   : > { %v476_v55 = vpop.f32.mrf.mxu0  ;;  %v494_v56 = vpop.f32.mrf.mxu1 }
 0x1e1   : > { %545 = vst [vmem:[%s1229_s22 + $0x18] sm:$0xff] %v476_v55 }
 0x1e2   : > { %551 = vst [vmem:[%s1229_s22 + $0x48] sm:$0xff] %v494_v56 }
 0x1e5   : > { %v509_v57 = vpop.f32.mrf.mxu2  ;;  %v530_v58 = vpop.f32.mrf.mxu3 }
 0x1e6   : > { %556 = vst [vmem:[%s1229_s22 + $0x70] sm:$0xff] %v509_v57 }
 0x1e7   : > { %563 = vst [vmem:[%s1229_s22 + $0xa8] sm:$0xff] %v530_v58 }
 0x1e8   : > { %v479_v59 = vpop.f32.mrf.mxu0  ;;  %v497_v60 = vpop.f32.mrf.mxu1 }
 0x1e9   : > { %546 = vst [vmem:[%s1229_s22 + $0x20] sm:$0xff] %v479_v59 }
 0x1ea   : > { %552 = vst [vmem:[%s1229_s22 + $0x50] sm:$0xff] %v497_v60 }
 0x1ed   : > { %v512_v61 = vpop.f32.mrf.mxu2  ;;  %v533_v62 = vpop.f32.mrf.mxu3 }
 0x1ee   : > { %557 = vst [vmem:[%s1229_s22 + $0x78] sm:$0xff] %v512_v61 }
 0x1ef   : > { %564 = vst [vmem:[%s1229_s22 + $0xb0] sm:$0xff] %v533_v62 }
 0x1f0   : > { %v482_v63 = vpop.f32.mrf.mxu0 }
 0x1f1   : > { %547 = vst [vmem:[%s1229_s22 + $0x28] sm:$0xff] %v482_v63 }
 0x1f5   : > { %v515_v0 = vpop.f32.mrf.mxu2  ;;  %v536_v1 = vpop.f32.mrf.mxu3 }
 0x1f6   : > { %558 = vst [vmem:[%s1229_s22 + $0x80] sm:$0xff] %v515_v0 }
 0x1f7   : > { %565 = vst [vmem:[%s1229_s22 + $0xb8] sm:$0xff] %v536_v1 }
 0x1fd   : > { %v518_v2 = vpop.f32.mrf.mxu2  ;;  %v539_v3 = vpop.f32.mrf.mxu3 }
 0x1fe   : > { %559 = vst [vmem:[%s1229_s22 + $0x88] sm:$0xff] %v518_v2 }
 0x1ff   : > { %566 = vst [vmem:[%s1229_s22 + $0xc0] sm:$0xff] %v539_v3 }
 0x200   : > { %1009 = shalt.err (!%p1006_p13)
}
 0x201   : > { %s1078_s0 = smov 128   ;;  %s1079_s4 = smov 384  }
 0x202   : > { %s1080_s5 = smov 8  }
 0x203   : > { %814 = dma.vmem_to_hbm [thread:$0]  (%p1185_p5), %s583_s27, 3200, %s585_s28, %s568_s29, %s1078_s0, %s1079_s4, %s1080_s5  }
 0x204 PF: > { %p836_p0 = scmp.ge.s32.totalorder %s1072_s17, 2  ;;  %s599_s10 = sand.u32 1, %s1052_s12  }
 0x205   : > { %s600_s22 = scalar_lea.sflag [#allocation5], %s599_s10 }
 0x206   : > { %p828_p3 = pnand %p836_p0, %p1146_p6 }
 0x208   : > { %p829_p7 = pneg %p828_p3 }
 0x20a   : > { %1047 = dma.done.wait (%p829_p7), %s600_s22, 3200  }
 0x20b   : > { %1049 = vsyncadd (%p829_p7), %s600_s22, 4294964096  ;;  %s18_s17 = sadd.s32 1, %s1072_s17   ;;  %s1326_s12 = smov %s1056_s13 }
 0x20c   : > { %p15_p2 = scmp.ge.s32.totalorder %s18_s17, 5   ;;  %s1327_s13 = smov %s1060_s14 }
 0x20d   : > { %s1328_s14 = smov %s1195_s26  ;;  %s1329_s15 = smov %s1068_s16 }
 0x20e   : > { %s1330_s16 = smov %s1332_s8  ;;  %17 = sbr.rel (!%p15_p2) target bundleno = 8 (0x8), region = 89 }
 0x213   :  { %606 = vsyncpa [#allocation4], 1 }
 0x214   :  { %608 = vsyncpa [#allocation4 + $0x1], 1 }
 0x215   :  { %609 = vsyncpa [#allocation7], 1 }
 0x216   :  { %610 = vsyncpa [#allocation5], 1 }
 0x217   :  { %612 = vsyncpa [#allocation5 + $0x1], 1 }

</bundles_post_ra>
